<compile_context>
chip_gen: v7x
topology: tpu7x:2x2x1
jax: 0.10.0
libtpu: 0.0.40
codegen_flags: <defaults>
</compile_context>

<pallas_src>
import functools

import jax
import jax.numpy as jnp
from jax import lax
from jax.experimental import pallas as pl
from jax.experimental.pallas import tpu as pltpu

_LANES = 128
_TARGET_BLOCK_BYTES = 2 * 1024 * 1024  # ~2 MiB of logits per grid step


def _ce_kernel(x_ref, t_ref, o_ref, acc_ref, *, n_valid_s, inv_n):
    b = pl.program_id(0)
    s = pl.program_id(1)

    @pl.when((b == 0) & (s == 0))
    def _():
        acc_ref[...] = jnp.zeros_like(acc_ref)

    x = x_ref[0].astype(jnp.float32)   # (C, TS); f32 math (v5e has no bf16 VPU/EUP)
    t = t_ref[0]                       # (1, TS) int32 class indices
    c, ts = x.shape

    # Numerically stable logsumexp over the class (sublane) axis.
    m = jnp.max(x, axis=0, keepdims=True)                            # (1, TS)
    lse = m + jnp.log(jnp.sum(jnp.exp(x - m), axis=0, keepdims=True))

    # Gather x[target, pos] via a one-hot select over the class axis.
    cls = lax.broadcasted_iota(jnp.int32, (c, ts), 0)
    picked = jnp.sum(jnp.where(cls == t, x, 0.0), axis=0, keepdims=True)

    # Mask the statically-known padded tail spatial positions (per batch row).
    col = s * ts + lax.broadcasted_iota(jnp.int32, (1, ts), 1)
    loss = jnp.where(col < n_valid_s, lse - picked, 0.0)             # (1, TS)

    # Lane-parallel partial sums; no per-step cross-lane reduce.
    acc_ref[...] += loss

    @pl.when((b == pl.num_programs(0) - 1) & (s == pl.num_programs(1) - 1))
    def _():
        total = jnp.sum(acc_ref[...], axis=1, keepdims=True)         # (1, 1)
        o_ref[...] = total * inv_n


def cross_entropy(inputs, targets, reduction="mean"):
    """Equivalent of F.cross_entropy(inputs, targets, reduction=...) forward pass.

    inputs:  (N, C) or (N, C, d1, ..., dk) logits (any float dtype).
    targets: (N,)   or (N, d1, ..., dk)    integer class indices.
    """
    if reduction not in ("mean", "sum"):
        # TODO(synk): reduction='none', ignore_index, label_smoothing and
        # probability-style (float) targets are not implemented in this kernel.
        raise NotImplementedError(f"reduction={reduction!r} not supported")

    if inputs.ndim == 2:
        n, c = inputs.shape
        x3 = inputs.T[None, :, :]                    # (1, C, N)
        t2 = targets.reshape(1, n)
        b, s_len = 1, n
    else:
        n, c = int(inputs.shape[0]), int(inputs.shape[1])
        s_len = 1
        for d in inputs.shape[2:]:
            s_len *= int(d)
        x3 = inputs.reshape(n, c, s_len)             # pure reshape; C stays on sublanes
        t2 = targets.reshape(n, s_len)
        b = n

    total_elems = b * s_len
    itemsize = jnp.dtype(inputs.dtype).itemsize

    # Spatial tile: lane-dense, sized so one logits block is ~_TARGET_BLOCK_BYTES
    # (keeps total VMEM for 2x double-buffered inputs + accumulator well under the
    # default scoped limits on v5e/v6e/v7x while amortizing per-grid-step overhead).
    # TODO(synk): very large C (e.g. LM vocab) would need C-tiling + online logsumexp.
    c_pad = ((c + 7) // 8) * 8
    ts = _TARGET_BLOCK_BYTES // (c_pad * max(itemsize, 4))
    ts = max(_LANES, (ts // _LANES) * _LANES)
    s128 = ((s_len + _LANES - 1) // _LANES) * _LANES
    ts = min(ts, s128)
    s_pad = ((s_len + ts - 1) // ts) * ts

    if s_pad != s_len:
        x3 = jnp.pad(x3, ((0, 0), (0, 0), (0, s_pad - s_len)))
        t2 = jnp.pad(t2, ((0, 0), (0, s_pad - s_len)))
    t3 = t2.astype(jnp.int32).reshape(b, 1, s_pad)

    inv_n = (1.0 / float(total_elems)) if reduction == "mean" else 1.0
    kernel = functools.partial(_ce_kernel, n_valid_s=s_len, inv_n=inv_n)

    out = pl.pallas_call(
        kernel,
        out_shape=jax.ShapeDtypeStruct((1, 1), jnp.float32),
        grid_spec=pltpu.PrefetchScalarGridSpec(
            num_scalar_prefetch=0,
            grid=(b, s_pad // ts),
            in_specs=[
                pl.BlockSpec((1, c, ts), lambda bi, si: (bi, 0, si)),
                pl.BlockSpec((1, 1, ts), lambda bi, si: (bi, 0, si)),
            ],
            out_specs=pl.BlockSpec((1, 1), lambda bi, si: (0, 0)),
            scratch_shapes=[pltpu.VMEM((1, ts), jnp.float32)],
        ),
        compiler_params=pltpu.CompilerParams(
            dimension_semantics=("arbitrary", "arbitrary"),
        ),
        cost_estimate=pl.CostEstimate(
            flops=6 * total_elems * c,
            transcendentals=total_elems * c,
            bytes_accessed=int(x3.size) * int(itemsize) + int(t3.size) * 4 + 4,
        ),
    )(x3, t3)

    return out[0, 0]


if __name__ == "__main__":
    key = jax.random.PRNGKey(0)
    k1, k2 = jax.random.split(key)

    # Small NCHW segmentation-style shapes for F.cross_entropy.
    N, C, H, W = 2, 4, 16, 16
    inputs = jax.random.normal(k1, (N, C, H, W), dtype=jnp.float32)      # logits
    targets = jax.random.randint(k2, (N, H, W), 0, C, dtype=jnp.int32)   # class idx

    loss = cross_entropy(inputs, targets, reduction="mean")
    jax.block_until_ready(loss)

    # Reference: plain-JAX softmax cross-entropy with integer targets (mean).
    xr = jnp.moveaxis(inputs, 1, -1).astype(jnp.float32)                 # (N,H,W,C)
    lse = jax.scipy.special.logsumexp(xr, axis=-1)
    picked = jnp.take_along_axis(xr, targets[..., None], axis=-1)[..., 0]
    ref = jnp.mean(lse - picked)

    assert jnp.allclose(loss, ref, atol=1e-5, rtol=1e-5), (loss, ref)
    print("KERNEL_OK")
</pallas_src>

<mosaic_0001>
module attributes {stable_mosaic.version = 11 : i64} {
  func.func @_ce_kernel(%arg0: i32, %arg1: i32, %arg2: memref<1x4x256xf32, #tpu.memory_space<vmem>>, %arg3: memref<1x1x256xi32, #tpu.memory_space<vmem>>, %arg4: memref<1x1xf32, #tpu.memory_space<vmem>>, %arg5: memref<1x256xf32, #tpu.memory_space<vmem>>) attributes {dimension_semantics = [#tpu.dimension_semantics<arbitrary>, #tpu.dimension_semantics<arbitrary>], iteration_bounds = array<i64: 2, 1>, scalar_prefetch = 0 : i64, scratch_operands = 1 : i64, tpu.core_type = #tpu.core_type<tc>, window_params = [{transform_indices = @transform_0, window_bounds = array<i64: 1, 4, 256>}, {transform_indices = @transform_1, window_bounds = array<i64: 1, 1, 256>}, {pipeline_mode = #tpu.pipeline_mode<synchronous>, transform_indices = @transform_2, window_bounds = array<i64: 1, 1>}]} {
    %c0_i32 = arith.constant 0 : i32
    %0 = arith.cmpi eq, %arg0, %c0_i32 : i32
    %c0_i32_0 = arith.constant 0 : i32
    %1 = arith.cmpi eq, %arg1, %c0_i32_0 : i32
    %2 = arith.andi %0, %1 : i1
    %3 = arith.extui %2 : i1 to i32
    %c0_i32_1 = arith.constant 0 : i32
    %4 = arith.cmpi ne, %3, %c0_i32_1 : i32
    scf.if %4 {
      %cst_18 = arith.constant 0.000000e+00 : f32
      %42 = vector.broadcast %cst_18 : f32 to vector<1x256xf32>
      %c0_19 = arith.constant 0 : index
      %c0_20 = arith.constant 0 : index
      %43 = vector.load %arg5[%c0_19, %c0_20] : memref<1x256xf32, #tpu.memory_space<vmem>>, vector<1x256xf32>
      tpu.vector_store %arg5[%c0_19, %c0_20], %42 {strides = array<i32>} : memref<1x256xf32, #tpu.memory_space<vmem>>, vector<1x256xf32>,
    } else {
    }
    %c0 = arith.constant 0 : index
    %c0_2 = arith.constant 0 : index
    %c0_3 = arith.constant 0 : index
    %5 = vector.load %arg2[%c0, %c0_2, %c0_3] : memref<1x4x256xf32, #tpu.memory_space<vmem>>, vector<1x4x256xf32>
    %6 = vector.shape_cast %5 : vector<1x4x256xf32> to vector<4x256xf32>
    %c0_4 = arith.constant 0 : index
    %c0_5 = arith.constant 0 : index
    %c0_6 = arith.constant 0 : index
    %7 = vector.load %arg3[%c0_4, %c0_5, %c0_6] : memref<1x1x256xi32, #tpu.memory_space<vmem>>, vector<1x1x256xi32>
    %8 = vector.shape_cast %7 : vector<1x1x256xi32> to vector<1x256xi32>
    %cst = arith.constant dense<0xFF800000> : vector<256xf32>
    %9 = vector.multi_reduction <maximumf>, %6, %cst [0] : vector<4x256xf32> to vector<256xf32>
    %10 = vector.shape_cast %9 : vector<256xf32> to vector<1x256xf32>
    %11 = vector.broadcast %10 : vector<1x256xf32> to vector<4x256xf32>
    %12 = arith.subf %6, %11 : vector<4x256xf32>
    %13 = math.exp %12 : vector<4x256xf32>
    %cst_7 = arith.constant dense<0.000000e+00> : vector<256xf32>
    %14 = vector.multi_reduction <add>, %13, %cst_7 [0] : vector<4x256xf32> to vector<256xf32>
    %15 = vector.shape_cast %14 : vector<256xf32> to vector<1x256xf32>
    %16 = math.log %15 : vector<1x256xf32>
    %17 = arith.addf %10, %16 : vector<1x256xf32>
    %18 = tpu.iota {dimensions = array<i32: 0>} : vector<4x256xi32>
    %19 = vector.broadcast %8 : vector<1x256xi32> to vector<4x256xi32>
    %20 = arith.cmpi eq, %18, %19 : vector<4x256xi32>
    %cst_8 = arith.constant 0.000000e+00 : f32
    %21 = vector.broadcast %cst_8 : f32 to vector<4x256xf32>
    %22 = arith.select %20, %6, %21 : vector<4x256xi1>, vector<4x256xf32>
    %cst_9 = arith.constant dense<0.000000e+00> : vector<256xf32>
    %23 = vector.multi_reduction <add>, %22, %cst_9 [0] : vector<4x256xf32> to vector<256xf32>
    %24 = vector.shape_cast %23 : vector<256xf32> to vector<1x256xf32>
    %c256_i32 = arith.constant 256 : i32
    %25 = arith.muli %arg1, %c256_i32 : i32
    %26 = tpu.iota {dimensions = array<i32: 1>} : vector<1x256xi32>
    %27 = vector.broadcast %25 : i32 to vector<1x256xi32>
    %28 = arith.addi %27, %26 : vector<1x256xi32>
    %c256_i32_10 = arith.constant 256 : i32
    %29 = vector.broadcast %c256_i32_10 : i32 to vector<1x256xi32>
    %30 = arith.cmpi slt, %28, %29 : vector<1x256xi32>
    %31 = arith.subf %17, %24 : vector<1x256xf32>
    %cst_11 = arith.constant 0.000000e+00 : f32
    %32 = vector.broadcast %cst_11 : f32 to vector<1x256xf32>
    %33 = arith.select %30, %31, %32 : vector<1x256xi1>, vector<1x256xf32>
    %c0_12 = arith.constant 0 : index
    %c0_13 = arith.constant 0 : index
    %34 = vector.load %arg5[%c0_12, %c0_13] : memref<1x256xf32, #tpu.memory_space<vmem>>, vector<1x256xf32>
    %35 = arith.addf %34, %33 : vector<1x256xf32>
    %c0_14 = arith.constant 0 : index
    %c0_15 = arith.constant 0 : index
    %36 = vector.load %arg5[%c0_14, %c0_15] : memref<1x256xf32, #tpu.memory_space<vmem>>, vector<1x256xf32>
    tpu.vector_store %arg5[%c0_14, %c0_15], %35 {strides = array<i32>} : memref<1x256xf32, #tpu.memory_space<vmem>>, vector<1x256xf32>,
    %c1_i32 = arith.constant 1 : i32
    %37 = arith.cmpi eq, %arg0, %c1_i32 : i32
    %c0_i32_16 = arith.constant 0 : i32
    %38 = arith.cmpi eq, %arg1, %c0_i32_16 : i32
    %39 = arith.andi %37, %38 : i1
    %40 = arith.extui %39 : i1 to i32
    %c0_i32_17 = arith.constant 0 : i32
    %41 = arith.cmpi ne, %40, %c0_i32_17 : i32
    scf.if %41 {
      %c0_18 = arith.constant 0 : index
      %c0_19 = arith.constant 0 : index
      %42 = vector.load %arg5[%c0_18, %c0_19] : memref<1x256xf32, #tpu.memory_space<vmem>>, vector<1x256xf32>
      %cst_20 = arith.constant dense<0.000000e+00> : vector<1xf32>
      %43 = vector.multi_reduction <add>, %42, %cst_20 [1] : vector<1x256xf32> to vector<1xf32>
      %44 = vector.shape_cast %43 : vector<1xf32> to vector<1x1xf32>
      %cst_21 = arith.constant 0.001953125 : f32
      %45 = vector.broadcast %cst_21 : f32 to vector<1x1xf32>
      %46 = arith.mulf %44, %45 : vector<1x1xf32>
      %c0_22 = arith.constant 0 : index
      %c0_23 = arith.constant 0 : index
      %47 = vector.load %arg4[%c0_22, %c0_23] : memref<1x1xf32, #tpu.memory_space<vmem>>, vector<1x1xf32>
      tpu.vector_store %arg4[%c0_22, %c0_23], %46 {strides = array<i32>} : memref<1x1xf32, #tpu.memory_space<vmem>>, vector<1x1xf32>,
    } else {
    }
    return
  }
  func.func @transform_0(%arg0: i32, %arg1: i32) -> (i32, i32, i32) {
    %c0_i32 = arith.constant 0 : i32
    %c0_i32_0 = arith.constant 0 : i32
    return %arg0, %c0_i32, %arg1 : i32, i32, i32
  }
  func.func @transform_1(%arg0: i32, %arg1: i32) -> (i32, i32, i32) {
    %c0_i32 = arith.constant 0 : i32
    %c0_i32_0 = arith.constant 0 : i32
    return %arg0, %c0_i32, %arg1 : i32, i32, i32
  }
  func.func @transform_2(%arg0: i32, %arg1: i32) -> (i32, i32) {
    %c0_i32 = arith.constant 0 : i32
    %c0_i32_0 = arith.constant 0 : i32
    %c0_i32_1 = arith.constant 0 : i32
    return %c0_i32, %c0_i32_0 : i32, i32
  }
}

</mosaic_0001>

<bundles_post_ra>
// kernel: tpu_custom_call.1
= control target key start
LH: loop header
LB: loop body
LE: loop exit
PB: predicated region body
PF: predicated region fallthrough
CT: control target
= control target key end

     0   :  { %7 = vsyncpa [#allocation4], 0  ;;  %s937_s0 = inlined_call_operand.hbm [shape: f32[2,4,256], index: 0, kind: input, shape index: {}]   ;;  %s938_s1 = inlined_call_operand.hbm [shape: s32[2,1,256], index: 1, kind: input, shape index: {}]   ;;  %s939_s2 = inlined_call_operand.hbm [shape: f32[1,1], index: 2, kind: output, shape index: {}]  }
   0x1   :  { %9 = vsyncpa [#allocation4 + $0x1], 0 }
   0x2   :  { %10 = vsyncpa [#allocation7], 0 }
   0x3   :  { %12 = vsyncpa [#allocation7 + $0x1], 0 }
   0x4   :  { %13 = vsyncpa [#allocation5], 0  ;;  %s720_s9 = smov 0   ;;  %s722_s10 = smov 0  }
   0x5   :  { %s724_s11 = smov 0   ;;  %s726_s12 = smov 0  }
   0x6   :  { %s728_s13 = smov 0   ;;  %s730_s14 = smov 0  }
   0x7 LB: > { %s456_s15 = sadd.s32 4294967295, %s698_s14   ;;  %s31_s16 = sadd.s32 1, %s694_s13  ;;  %s698_s14 = sphi %s730_s14, %s19_s14   ;;  %s694_s13 = sphi %s728_s13, %s954_s13   ;;  %s690_s12 = sphi %s726_s12, %s953_s12   ;;  %s686_s11 = sphi %s724_s11, %s952_s11   ;;  %s682_s10 = sphi %s722_s10, %s951_s10   ;;  %s678_s9 = sphi %s720_s9, %s950_s9  }
   0x8   : > { %p33_p0 = scmp.ge.s32.totalorder %s31_s16, 2  ;;  %s40_s17 = sadd.s32 1, %s686_s11 }
   0x9   : > { %p47_p1 = scmp.ne.s32.totalorder %s686_s11, %s682_s10  ;;  %p48_p2 = scmp.eq.s32.totalorder %s698_s14, 0 }
   0xa   : > { %s956_s16 = smov (%p33_p0, %s31_s16), 0  ;;  %p53_p4 = scmp.ne.s32.totalorder %s682_s10, %s678_s9 }
   0xb   : > { %p756_p3 = por %p48_p2, %p47_p1  ;;  %s35_s19 = ssub.s32 %s694_s13, %s956_s16 }
   0xc   : > { %p54_p5 = scmp.eq.s32.totalorder %s456_s15, 0  ;;  %p38_p6 = scmp.eq.s32.totalorder %s35_s19, 0 }
   0xd   : > { %p493_p8 = scmp.lt.s32.totalorder %s698_s14, 2  ;;  %s774_s22 = sand.u32 1, %s686_s11  }
   0xe   : > { %p765_p7 = por %p54_p5, %p53_p4  ;;  %s474_s23 = sshll.u32 %s694_s13, 7 }
   0xf   : > { %s771_s21 = scalar_select %p38_p6, %s686_s11, %s40_s17  }
  0x10   : > { %s942_s20 = scalar_select %p765_p7, 1, 0 }
  0x11   : > { %s459_s24 = sshll.u32 %s774_s22, 3  ;;  %s781_s27 = scalar_lea.hbm %s937_s0, %s474_s23 }
  0x12   : > { %s130_s28 = scalar_lea.vmem [#allocation3], %s459_s24  ;;  %p785_p9 = pnand %p493_p8, %p756_p3 }
  0x13   : > { %s140_s29 = sshll.u32 %s130_s28, 4  ;;  %s127_s3 = scalar_lea.sflag [#allocation4], %s774_s22  ;;  %s789_s29 = int_to_ptr.vmem [resolvable:$true] %s140_s29 }
  0x14   : > { %s554_s4 = scalar_lea.hbm %s781_s27, 128  ;;  %p556_p13 = pneg %p785_p9 }
  0x15   : > { %p555_p12 = scmp.ne.s32.totalorder %s781_s27, %s554_s4  ;;  %s559_s7 = scalar_lea.hbm %s937_s0, 256 }
  0x16   : > { %p560_p2 = scmp.lt.u32.totalorder %s781_s27, %s937_s0  ;;  %p561_p3 = scmp.lt.u32.totalorder %s559_s7, %s554_s4 }
  0x17   : > { %p557_p0 = pnand %p556_p13, %p555_p12  ;;  %p563_p5 = scmp.lt.u32.totalorder %s554_s4, %s781_s27 }
  0x18   : > { %p562_p4 = por %p561_p3, %p560_p2 }
  0x19   : > { %p558_p1 = pneg %p557_p0 }
  0x1a   : > { %p564_p6 = por %p563_p5, %p562_p4 }
  0x1c   : > { %p565_p8 = pnand %p564_p6, %p558_p1 }
  0x1e   : > { %568 = shalt.err (!%p565_p8)
}
  0x1f   : > { %s569_s17 = scalar_lea.vmem %s789_s29, 128  ;;  %s700_s18 = smov [#allocation3]  }
  0x20   : > { %p570_p12 = scmp.ne.s32.totalorder %s789_s29, %s569_s17  ;;  %s574_s19 = sshll.u32 %s700_s18, 4  ;;  %s575_s19 = int_to_ptr.vmem [resolvable:$false] %s574_s19 }
  0x21   : > { %s576_s23 = scalar_lea.vmem %s575_s19, 256  ;;  %p577_p11 = scmp.lt.s32.totalorder %s789_s29, %s575_s19 }
  0x22   : > { %p572_p0 = pnand %p570_p12, %p556_p13  ;;  %p578_p2 = scmp.lt.s32.totalorder %s576_s23, %s569_s17 }
  0x24   : > { %p573_p10 = pneg %p572_p0  ;;  %p579_p3 = por %p578_p2, %p577_p11 }
  0x26   : > { %p580_p4 = pnand %p579_p3, %p573_p10 }
  0x28   : > { %583 = shalt.err (!%p580_p4)
}
  0x29   : > { %489 = dma.hbm_to_vmem [thread:$0]  (!%p785_p9), %s781_s27, 128, %s789_s29, %s127_s3  }
  0x2a   : > { %p944_p1 = scmp.lt.s32.totalorder %s698_s14, 3  ;;  %p945_p5 = scmp.ge.s32.totalorder %s698_s14, 1 }
  0x2b   : > { %s462_s25 = sshll.u32 %s774_s22, 1  ;;  %s475_s26 = sshll.u32 %s694_s13, 5 }
  0x2c   : > { %p823_p6 = pnand %p945_p5, %p944_p1  ;;  %s832_s5 = scalar_lea.hbm %s938_s1, %s475_s26 }
  0x2d   : > { %s151_s6 = scalar_lea.vmem [#allocation6], %s462_s25  ;;  %s148_s27 = scalar_lea.sflag [#allocation7], %s774_s22 }
  0x2e   : > { %s946_s24 = scalar_select %p823_p6, 1, 0 }
  0x2f   : > { %s161_s7 = sshll.u32 %s151_s6, 4  ;;  %s584_s29 = scalar_lea.hbm %s832_s5, 32  ;;  %s162_s7 = int_to_ptr.vmem [resolvable:$true] %s161_s7 }
  0x30   : > { %p585_p10 = scmp.ne.s32.totalorder %s832_s5, %s584_s29  ;;  %s589_s9 = scalar_lea.hbm %s938_s1, 64 }
  0x31   : > { %p590_p12 = scmp.lt.u32.totalorder %s832_s5, %s938_s1  ;;  %p591_p0 = scmp.lt.u32.totalorder %s589_s9, %s584_s29 }
  0x32   : > { %p587_p11 = pnand %p585_p10, %p556_p13  ;;  %p593_p3 = scmp.lt.u32.totalorder %s584_s29, %s832_s5 }
  0x33   : > { %p592_p2 = por %p591_p0, %p590_p12 }
  0x34   : > { %p588_p8 = pneg %p587_p11 }
  0x35   : > { %p594_p4 = por %p593_p3, %p592_p2 }
  0x37   : > { %p595_p1 = pnand %p594_p4, %p588_p8 }
  0x39   : > { %598 = shalt.err (!%p595_p1)
}
  0x3a   : > { %s599_s22 = scalar_lea.vmem %s162_s7, 32  ;;  %s701_s19 = smov [#allocation6]  }
  0x3b   : > { %p600_p5 = scmp.ne.s32.totalorder %s162_s7, %s599_s22  ;;  %s604_s23 = sshll.u32 %s701_s19, 4  ;;  %s605_s23 = int_to_ptr.vmem [resolvable:$false] %s604_s23 }
  0x3c   : > { %s606_s25 = scalar_lea.vmem %s605_s23, 64  ;;  %p607_p7 = scmp.lt.s32.totalorder %s162_s7, %s605_s23 }
  0x3d   : > { %p602_p10 = pnand %p600_p5, %p556_p13  ;;  %p608_p6 = scmp.lt.s32.totalorder %s606_s25, %s599_s22 }
  0x3f   : > { %p603_p11 = pneg %p602_p10  ;;  %p609_p0 = por %p608_p6, %p607_p7 }
  0x41   : > { %p610_p12 = pnand %p609_p0, %p603_p11 }
  0x43   : > { %613 = shalt.err (!%p610_p12)
}
  0x44   : > { %492 = dma.hbm_to_vmem [thread:$0]  (!%p785_p9), %s832_s5, 32, %s162_s7, %s148_s27  }
  0x45   : > { %p947_p8 = scmp.ne.s32.totalorder %s946_s24, 0 }
  0x46   : > { %s172_s26 = sand.u32 (!%p947_p8), 1, %s682_s10   ;;  %p948_p13 = scmp.ne.s32.totalorder (!%p947_p8), %s942_s20, 0 }
  0x47   : > { %170 = sbr.rel (%p947_p8) target bundleno = 347 (0x15b), region = 28  ;;  %s466_s28 = sshll.u32 (!%p947_p8), %s172_s26, 3 }
  0x48   : > { %s173_s4 = scalar_lea.sflag (!%p947_p8), [#allocation4], %s172_s26  ;;  %s176_s6 = scalar_lea.vmem (!%p947_p8), [#allocation3], %s466_s28 }
  0x4e   : > { %665 = dma.done.wait (%p948_p13), %s173_s4, 128  }
  0x4f   : > { %667 = vsyncadd (%p948_p13), %s173_s4, 4294967168  ;;  %s467_s29 = sshll.u32 %s172_s26, 1  ;;  %s182_s3 = scalar_lea.sflag [#allocation7], %s172_s26 }
  0x50   : > { %s861_s30 = scalar_lea.vmem [#allocation6], %s467_s29 }
  0x51   : > { %669 = dma.done.wait (%p948_p13), %s182_s3, 32  }
  0x52   : > { %671 = vsyncadd (%p948_p13), %s182_s3, 4294967264  ;;  %p208_p7 = scmp.eq.s32.totalorder %s690_s12, 0 }
  0x53   : > { %v214_v0 = vlaneseq (%p208_p7)  ;;  %v702_v1 = vmov (%p208_p7), 0.0  }
  0x54   : > { %213 = sbr.rel (!%p208_p7) target bundleno = 91 (0x5b), region = 40 }
  0x55   : > { %vm216_vm0 = vcmp.lt.s32.totalorder (%p208_p7), %v214_v0, 256 }
  0x56   : > { %218 = vst.msk [vmem:[#allocation2] sm:$0x3] (%p208_p7), %vm216_vm0, %v702_v1 }
  0x5b PF: > { %v219_v2 = vld [vmem:[%s176_s6] sm:$0xff]  ;;  %vm224_vm1 = vcmask 1043456   ;;  %p335_p9 = scmp.eq.s32.totalorder %s690_s12, 1  ;;  %v269_v17 = vlaneseq  ;;  %v220_v24 = vld [vmem:[%s861_s30] sm:$0x3] }
  0x5c   : > { %v222_v3 = vcombine.high %v219_v2, %v219_v2  ;;  %v225_v4 = vsel %vm224_vm1, %v219_v2, -inf  ;;  %v703_v58 = vmov 1966171168   ;;  %vm352_vm5 = vcmask (%p335_p9), 1040384  }
  0x5d   : > { %v226_v5 = vrot.slane %v225_v4, 4  ;;  %v872_v20 = vshrl.u32 %v269_v17, 7  ;;  %v315_v59 = vunpack.c.l.s4 %v703_v58  ;;  %vm332_vm4 = vcmp.lt.s32.totalorder %v269_v17, 256 }
  0x5e   : > { %v232_v6 = vsel %vm224_vm1, %v222_v3, -inf  ;;  %vm359_vm6 = vcmask (%p335_p9), 0  }
  0x5f   : > { %v227_v7 = vmax.f32 %v225_v4, %v226_v5  ;;  %v233_v8 = vrot.slane %v232_v6, 4  ;;  %v273_v23 = vsub.s32 0, %v872_v20  ;;  %v277_v25 = vsub.s32 1, %v872_v20 }
  0x61   : > { %v228_v9 = vrot.slane %v227_v7, 2  ;;  %v234_v10 = vmax.f32 %v232_v6, %v233_v8  ;;  %v274_v26 = vrot.slane %v220_v24, %v273_v23  ;;  %v278_v27 = vrot.slane %v220_v24, %v277_v25 }
  0x63   : > { %v229_v11 = vmax.f32 %v227_v7, %v228_v9  ;;  %v235_v12 = vrot.slane %v234_v10, 2  ;;  %vm279_vm2 = vcmp.eq.s32.totalorder %v872_v20, %v274_v26  ;;  %vm280_vm3 = vcmp.eq.s32.totalorder %v872_v20, %v278_v27 }
  0x64   : > { %v281_v28 = vsel %vm279_vm2, %v219_v2, 0.0  ;;  %v282_v32 = vsel %vm280_vm3, %v222_v3, 0.0  ;;  %v316_v3 = vunpack.c.0.s8 %v315_v59 }
  0x65   : > { %v230_v13 = vrot.slane %v229_v11, 1  ;;  %v236_v14 = vmax.f32 %v234_v10, %v235_v12  ;;  %v283_v34 = vsel %vm224_vm1, %v281_v28, 0.0  ;;  %v290_v38 = vsel %vm224_vm1, %v282_v32, 0.0  ;;  %v310_v10 = vld [vmem:[#allocation2] sm:$0x3] }
  0x66   : > { %v284_v39 = vrot.slane %v283_v34, 4  ;;  %v291_v42 = vrot.slane %v290_v38, 4  ;;  %v319_v7 = vsub.s32 %v316_v3, %v872_v20 }
  0x67   : > { %v231_v15 = vmax.f32 %v229_v11, %v230_v13  ;;  %v237_v16 = vrot.slane %v236_v14, 1 }
  0x68   : > { %v285_v45 = vadd.f32 %v284_v39, %v283_v34  ;;  %v292_v48 = vadd.f32 %v291_v42, %v290_v38 }
  0x69   : > { %v238_v18 = vmax.f32 %v236_v14, %v237_v16 }
  0x6a   : > { %v286_v51 = vrot.slane %v285_v45, 2  ;;  %v293_v53 = vrot.slane %v292_v48, 2 }
  0x6b   : > { %v241_v19 = vcombine.low %v231_v15, %v238_v18 }
  0x6c   : > { %v287_v54 = vadd.f32 %v286_v51, %v285_v45  ;;  %v294_v55 = vadd.f32 %v293_v53, %v292_v48 }
  0x6d   : > { %v243_v21 = vsub.f32 %v219_v2, %v241_v19 }
  0x6e   : > { %v288_v56 = vrot.slane %v287_v54, 1  ;;  %v295_v57 = vrot.slane %v294_v55, 1 }
  0x6f   : > { %v244_v22 = vmul.f32 1.442695, %v243_v21 }
  0x70   : > { %v289_v62 = vadd.f32 %v288_v56, %v287_v54  ;;  %v296_v2 = vadd.f32 %v295_v57, %v294_v55 }
  0x71   : > { %548 = vpow2.f32 %v244_v22 }
  0x7b   : > { %v549_v29 = vpop.eup %548 }
  0x7c   : > { %v247_v30 = vcombine.high %v549_v29, %v549_v29  ;;  %v249_v31 = vsel %vm224_vm1, %v549_v29, 0.0 }
  0x7d   : > { %v250_v33 = vrot.slane %v249_v31, 4 }
  0x7e   : > { %v256_v35 = vsel %vm224_vm1, %v247_v30, 0.0 }
  0x7f   : > { %v251_v36 = vadd.f32 %v250_v33, %v249_v31  ;;  %v257_v37 = vrot.slane %v256_v35, 4 }
  0x81   : > { %v252_v40 = vrot.slane %v251_v36, 2  ;;  %v258_v41 = vadd.f32 %v257_v37, %v256_v35 }
  0x83   : > { %v253_v43 = vadd.f32 %v252_v40, %v251_v36  ;;  %v259_v44 = vrot.slane %v258_v41, 2 }
  0x85   : > { %v254_v46 = vrot.slane %v253_v43, 1  ;;  %v260_v47 = vadd.f32 %v259_v44, %v258_v41 }
  0x87   : > { %v255_v49 = vadd.f32 %v254_v46, %v253_v43  ;;  %v261_v50 = vrot.slane %v260_v47, 1 }
  0x89   : > { %v262_v52 = vadd.f32 %v261_v50, %v260_v47  ;;  %550 = vlog2.f32 %v255_v49 }
  0x8b   : > { %552 = vlog2.f32 %v262_v52 }
  0x93   : > { %v551_v60 = vpop.eup %550 }
  0x94   : > { %v264_v61 = vmul.f32 0.6931472, %v551_v60 }
  0x95   : > { %v553_v63 = vpop.eup %552 }
  0x96   : > { %v266_v0 = vmul.f32 0.6931472, %v553_v63  ;;  %v267_v1 = vadd.f32 %v264_v61, %v231_v15 }
  0x98   : > { %v268_v4 = vadd.f32 %v266_v0, %v238_v18  ;;  %v306_v5 = vsub.f32 %v267_v1, %v289_v62 }
  0x9a   : > { %v307_v6 = vsub.f32 %v268_v4, %v296_v2 }
  0x9c   : > { %v313_v8 = vcombine.low %v306_v5, %v307_v6 }
  0x9e   : > { %v320_v9 = vrot.slane %v313_v8, %v319_v7  ;;  %339 = sbr.rel (!%p335_p9) target bundleno = 322 (0x142), region = 44 }
  0xa0   : > { %v327_v11 = vrot.slane %v320_v9, %v319_v7 }
  0xa2   : > { %v329_v12 = vadd.f32 %v327_v11, %v310_v10 }
  0xa4   : > { %334 = vst.msk [vmem:[#allocation2] sm:$0x3] %vm332_vm4, %v329_v12 }
  0xab   : > { %v340_v13 = vld [vmem:[#allocation2] sm:$0x3] }
  0xac   : > { %v345_v14 = vrot.slane %v340_v13, %v273_v23  ;;  %v349_v15 = vrot.slane %v340_v13, %v277_v25 }
  0xae   : > { %v353_v16 = vsel %vm352_vm5, %v345_v14, 0.0  ;;  %v354_v18 = vsel %vm352_vm5, %v349_v15, 0.0 }
  0xaf   : > { %v355_v19 = vadd.f32 %v354_v18, %v353_v16 }
  0xb1   : > { %356 = vadd.xlane.f32.xlu0 %v355_v19 }
 0x13e   : > { %v357_v21 = vpop.xlane.xlu0 %356 }
 0x13f   : > { %v358_v22 = vmul.f32 0.001953125, %v357_v21 }
 0x141   : > { %360 = vst.msk [vmem:[#allocation8] sm:$0x1] %vm359_vm6, %v358_v22 }
 0x142 PF: > { %p893_p6 = scmp.eq.s32.totalorder %s456_s15, 1  ;;  %s704_s20 = smov [#allocation8]  }
 0x143   : > { %s368_s24 = sshll.u32 %s704_s20, 4  ;;  %s369_s24 = int_to_ptr.vmem [resolvable:$true] %s368_s24 }
 0x144   : > { %s614_s5 = scalar_lea.vmem %s369_s24, 16  ;;  %s620_s7 = scalar_lea.vmem %s369_s24, 32 }
 0x145   : > { %p615_p2 = scmp.ne.s32.totalorder %s369_s24, %s614_s5  ;;  %p621_p1 = scmp.lt.s32.totalorder %s369_s24, %s369_s24 }
 0x146   : > { %p622_p5 = scmp.lt.s32.totalorder %s620_s7, %s614_s5 }
 0x147   : > { %p616_p3 = pnand %p615_p2, %p893_p6 }
 0x148   : > { %p623_p10 = por %p622_p5, %p621_p1 }
 0x149   : > { %p617_p4 = pneg %p616_p3 }
 0x14b   : > { %p624_p11 = pnand %p623_p10, %p617_p4 }
 0x14d   : > { %627 = shalt.err (!%p624_p11)
}
 0x14e   : > { %s628_s8 = scalar_lea.hbm %s939_s2, 16 }
 0x14f   : > { %p629_p0 = scmp.ne.s32.totalorder %s939_s2, %s628_s8  ;;  %p634_p13 = scmp.lt.u32.totalorder %s628_s8, %s939_s2 }
 0x151   : > { %p630_p12 = pnand %p629_p0, %p893_p6 }
 0x153   : > { %p631_p8 = pneg %p630_p12 }
 0x155   : > { %p636_p7 = pnand %p634_p13, %p631_p8 }
 0x157   : > { %639 = shalt.err (!%p636_p7)
}
 0x158   : > { %483 = dma.vmem_to_hbm [thread:$0]  (%p893_p6), %s369_s24, 16, %s939_s2, [#allocation5]  }
 0x159   : > { %673 = dma.done.wait (%p893_p6), [#allocation5], 16  }
 0x15a   : > { %675 = vsyncadd (%p893_p6), [#allocation5], 4294967280 }
 0x15b PF: > { %s19_s14 = sadd.s32 1, %s698_s14   ;;  %s950_s9 = smov %s682_s10 }
 0x15c   : > { %p16_p9 = scmp.ge.s32.totalorder %s19_s14, 4   ;;  %s951_s10 = smov %s686_s11 }
 0x15d   : > { %s952_s11 = smov %s771_s21  ;;  %s953_s12 = smov %s694_s13 }
 0x15e   : > { %s954_s13 = smov %s956_s16  ;;  %18 = sbr.rel (!%p16_p9) target bundleno = 7 (0x7), region = 86 }
 0x165   :  { %381 = vsyncpa [#allocation4], 1 }
 0x166   :  { %383 = vsyncpa [#allocation4 + $0x1], 1 }
 0x167   :  { %384 = vsyncpa [#allocation7], 1 }
 0x168   :  { %386 = vsyncpa [#allocation7 + $0x1], 1 }
 0x169   :  { %387 = vsyncpa [#allocation5], 1 }
 0x16a   :  { %389 = vsyncpa [#allocation5 + $0x1], 1 }

</bundles_post_ra>
